<compile_context>
chip_gen: v7x
topology: tpu7x:2x2x1
jax: 0.10.0
libtpu: 0.0.40
codegen_flags: <defaults>
</compile_context>

<pallas_src>
import functools

import jax
import jax.numpy as jnp
from jax.experimental import pallas as pl
from jax.experimental.pallas import tpu as pltpu


def _round_up(v, m):
    return ((v + m - 1) // m) * m


def _sigmoid(u):
    # exp on the EUP + approximate reciprocal on the EUP (keeps the divide off
    # the VALU slot, which is the binding slot when D is small).
    return pl.reciprocal(1.0 + jnp.exp(-u), approx=True)


def gating_kernel(x_ref, y_ref, wy_ref, by_ref, ux_ref, ug_ref, o_ref, *, d):
    """One (TM, d) row tile of the gated residual.

    x_ref, y_ref, o_ref : [TM, d]  float32
    wy_ref : [d, 3d] bf16  fused Wr|Wz|Wg
    by_ref : [1, 3d] f32   fused folded biases (br+bur | bz+buz-bg | bgw+bug)
    ux_ref : [d, 2d] bf16  fused Ur|Uz
    ug_ref : [d, d]  bf16
    """
    x = x_ref[...]                      # f32 (kept f32 for the residual path)
    y = y_ref[...]
    wdt = wy_ref.dtype                  # bf16
    x_m = x.astype(wdt)
    y_m = y.astype(wdt)

    # --- r / z gates: [D,2D] y-side slice + fused x-side Ur|Uz -------------
    pre_rz = (jnp.dot(y_m, wy_ref[:, :2 * d], preferred_element_type=jnp.float32)
              + jnp.dot(x_m, ux_ref[...], preferred_element_type=jnp.float32)
              + by_ref[:, :2 * d])
    r = _sigmoid(pre_rz[:, :d])
    z = _sigmoid(pre_rz[:, d:])

    # --- h gate: issued after r/z are consumed (lower peak vreg pressure) --
    pre_h = (jnp.dot(y_m, wy_ref[:, 2 * d:], preferred_element_type=jnp.float32)
             + jnp.dot((r * x).astype(wdt), ug_ref[...],
                       preferred_element_type=jnp.float32)
             + by_ref[:, 2 * d:])
    h = jnp.tanh(pre_h)

    # g = (1 - z) * x + z * h  ==  x + z * (h - x)
    o_ref[...] = (x + z * (h - x)).astype(o_ref.dtype)


def prepare_params(params, bg=0.1, weight_dtype=jnp.bfloat16):
    """One-time prep: pad feature dim to 128, fuse weights, fold biases.

    Returns a dict consumed directly by `gating_forward` on every call, so no
    per-call HBM re-padding / re-concatenation of weights happens.
    """
    D = params["Wr"].shape[0]
    Dp = _round_up(D, 128)
    pad = Dp - D

    def pw(w):  # [D,D] -> [Dp,Dp] in weight_dtype (bf16 by default)
        return jnp.pad(w, ((0, pad), (0, pad))).astype(weight_dtype)

    def pb(b):  # [1,D] -> [1,Dp] kept in f32 (added post-matmul in f32)
        return jnp.pad(b, ((0, 0), (0, pad))).astype(jnp.float32)

    wy = jnp.concatenate([pw(params["Wr"]), pw(params["Wz"]), pw(params["Wg"])],
                         axis=1)                                        # [Dp, 3Dp]
    ux = jnp.concatenate([pw(params["Ur"]), pw(params["Uz"])], axis=1)  # [Dp, 2Dp]
    ug = pw(params["Ug"])                                               # [Dp, Dp]
    by = jnp.concatenate([pb(params["br"] + params["bur"]),
                          pb(params["bz"] + params["buz"] - bg),
                          pb(params["bgw"] + params["bug"])], axis=1)   # [1, 3Dp]

    return {"wy": wy, "by": by, "ux": ux, "ug": ug,
            "d_input": int(D), "d_pad": int(Dp)}


# Cleared on first call if this jax build rejects per-spec pipeline_mode.
_SINGLE_BUFFER_WEIGHTS = True


def _const_spec(shape, single_buffer):
    """VMEM-resident block (constant index_map); optionally single-buffered."""
    idx = lambda i: (0,) * len(shape)
    if single_buffer:
        return pl.BlockSpec(shape, idx, pipeline_mode=pl.Buffered(1))
    return pl.BlockSpec(shape, idx)


def gating_forward(x, y, fused, *, tm=None, vmem_cap_bytes=56 * 1024 * 1024):
    """x, y: [N, D] float32.  fused: output of `prepare_params`.

    tm: row-tile size. Tune per generation for large N (v6e: 256-512,
        v7x: 256, v5e: 128-256). Default picks min(256, round_up(N, 8)).
    """
    N, D = x.shape
    Dp = fused["d_pad"]
    assert D == fused["d_input"], "input feature dim does not match params"

    # Feature padding to a lane multiple is required for the K contraction;
    # no-op when D is already a multiple of 128.  No row padding (cdiv grid).
    if D != Dp:
        x = jnp.pad(x, ((0, 0), (0, Dp - D)))
        y = jnp.pad(y, ((0, 0), (0, Dp - D)))

    TM = tm if tm is not None else min(256, _round_up(max(N, 1), 8))
    grid = (pl.cdiv(N, TM),)

    row_spec = pl.BlockSpec((TM, Dp), lambda i: (i, 0))

    # VMEM footprint -> explicit scoped-VMEM limit (capped for v7x's 64 MiB/TC).
    wdt_bytes = jnp.dtype(fused["wy"].dtype).itemsize
    wbytes = (fused["wy"].size + fused["ux"].size + fused["ug"].size) * wdt_bytes
    bbytes = fused["by"].size * 4
    abytes = 3 * 2 * TM * Dp * 4          # x, y, out tiles, double-buffered
    tbytes = 8 * TM * Dp * 4              # in-kernel f32 temporaries
    footprint = wbytes + bbytes + abytes + tbytes
    vmem_limit = int(min(vmem_cap_bytes, max(32 * 1024 * 1024, 2 * footprint)))

    cost = pl.CostEstimate(
        flops=int(2 * N * Dp * Dp * 6),
        transcendentals=int(5 * N * Dp),
        bytes_accessed=int(wbytes + bbytes + 3 * N * Dp * 4),
    )

    def build(single_buffer):
        in_specs = [
            row_spec, row_spec,
            _const_spec((Dp, 3 * Dp), single_buffer),
            _const_spec((1, 3 * Dp), single_buffer),
            _const_spec((Dp, 2 * Dp), single_buffer),
            _const_spec((Dp, Dp), single_buffer),
        ]
        return pl.pallas_call(
            functools.partial(gating_kernel, d=Dp),
            out_shape=jax.ShapeDtypeStruct((N, Dp), x.dtype),
            grid=grid,
            in_specs=in_specs,
            out_specs=row_spec,
            compiler_params=pltpu.CompilerParams(
                dimension_semantics=("parallel",),
                vmem_limit_bytes=vmem_limit),
            cost_estimate=cost,
        )

    args = (x, y, fused["wy"], fused["by"], fused["ux"], fused["ug"])

    global _SINGLE_BUFFER_WEIGHTS
    if _SINGLE_BUFFER_WEIGHTS:
        try:
            return build(True)(*args)[:, :D]
        except Exception:
            # This jax build does not support per-spec pipeline_mode; fall back
            # to default (double-buffered) resident weight blocks.
            _SINGLE_BUFFER_WEIGHTS = False
    return build(False)(*args)[:, :D]


def init_params(key, d_input):
    """Deterministic init matching nn.Linear's U(-1/sqrt(d), 1/sqrt(d)).

    Weights are stored already transposed ([in, out]) so the kernel does v @ W.
    """
    bound = 1.0 / (d_input ** 0.5)
    names_w = ["Wr", "Ur", "Wz", "Uz", "Wg", "Ug"]
    names_b = ["br", "bur", "bz", "buz", "bgw", "bug"]
    keys = jax.random.split(key, 2 * len(names_w))
    params = {}
    for i, (wn, bn) in enumerate(zip(names_w, names_b)):
        params[wn] = jax.random.uniform(
            keys[2 * i], (d_input, d_input), jnp.float32, -bound, bound)
        params[bn] = jax.random.uniform(
            keys[2 * i + 1], (1, d_input), jnp.float32, -bound, bound)
    return params


def reference_forward(x, y, params, bg=0.1):
    # Pure-JAX f32 reference mirroring the PyTorch module.
    r = jax.nn.sigmoid(y @ params["Wr"] + params["br"]
                       + x @ params["Ur"] + params["bur"])
    z = jax.nn.sigmoid(y @ params["Wz"] + params["bz"]
                       + x @ params["Uz"] + params["buz"] - bg)
    h = jnp.tanh(y @ params["Wg"] + params["bgw"]
                 + (r * x) @ params["Ug"] + params["bug"])
    return (1.0 - z) * x + z * h


if __name__ == "__main__":
    d_input = 32   # feature dim of GatingMechanism
    n_tokens = 8   # batch of token embeddings

    key = jax.random.PRNGKey(0)
    kx, ky, kp = jax.random.split(key, 3)
    x = jax.random.normal(kx, (n_tokens, d_input), jnp.float32)
    y = jax.random.normal(ky, (n_tokens, d_input), jnp.float32)
    params = init_params(kp, d_input)

    fused = prepare_params(params, bg=0.1)          # one-time prep step
    out = gating_forward(x, y, fused)
    out = jax.block_until_ready(out)

    ref = reference_forward(x, y, params, bg=0.1)
    assert out.shape == (n_tokens, d_input)
    err = float(jnp.max(jnp.abs(out - ref)))
    # bf16 matmul inputs + approx reciprocal vs. f32 reference.
    assert err < 2e-2, f"mismatch vs reference: max abs err {err}"

    print("KERNEL_OK")
</pallas_src>

<mosaic_0001>
module attributes {stable_mosaic.version = 11 : i64} {
  func.func @gating_kernel(%arg0: i32, %arg1: memref<8x128xf32, #tpu.memory_space<vmem>>, %arg2: memref<8x128xf32, #tpu.memory_space<vmem>>, %arg3: memref<128x384xbf16, #tpu.memory_space<vmem>>, %arg4: memref<1x384xf32, #tpu.memory_space<vmem>>, %arg5: memref<128x256xbf16, #tpu.memory_space<vmem>>, %arg6: memref<128x128xbf16, #tpu.memory_space<vmem>>, %arg7: memref<8x128xf32, #tpu.memory_space<vmem>>) attributes {dimension_semantics = [#tpu.dimension_semantics<parallel>], iteration_bounds = array<i64: 1>, scalar_prefetch = 0 : i64, scratch_operands = 0 : i64, tpu.core_type = #tpu.core_type<tc>, window_params = [{transform_indices = @transform_0, window_bounds = array<i64: 8, 128>}, {transform_indices = @transform_1, window_bounds = array<i64: 8, 128>}, {pipeline_mode = #tpu.pipeline_mode<synchronous>, transform_indices = @transform_2, window_bounds = array<i64: 128, 384>}, {pipeline_mode = #tpu.pipeline_mode<synchronous>, transform_indices = @transform_3, window_bounds = array<i64: 1, 384>}, {pipeline_mode = #tpu.pipeline_mode<synchronous>, transform_indices = @transform_4, window_bounds = array<i64: 128, 256>}, {pipeline_mode = #tpu.pipeline_mode<synchronous>, transform_indices = @transform_5, window_bounds = array<i64: 128, 128>}, {transform_indices = @transform_6, window_bounds = array<i64: 8, 128>}]} {
    %c0 = arith.constant 0 : index
    %c0_0 = arith.constant 0 : index
    %0 = vector.load %arg1[%c0, %c0_0] : memref<8x128xf32, #tpu.memory_space<vmem>>, vector<8x128xf32>
    %c0_1 = arith.constant 0 : index
    %c0_2 = arith.constant 0 : index
    %1 = vector.load %arg2[%c0_1, %c0_2] : memref<8x128xf32, #tpu.memory_space<vmem>>, vector<8x128xf32>
    %2 = arith.truncf %0 : vector<8x128xf32> to vector<8x128xbf16>
    %3 = arith.truncf %1 : vector<8x128xf32> to vector<8x128xbf16>
    %c0_3 = arith.constant 0 : index
    %c0_4 = arith.constant 0 : index
    %4 = vector.load %arg3[%c0_3, %c0_4] : memref<128x384xbf16, #tpu.memory_space<vmem>>, vector<128x256xbf16>
    %cst = arith.constant dense<0.000000e+00> : vector<8x256xf32>
    %5 = tpu.matmul %3, %4, %cst {dimension_numbers = #tpu.dot_dimension_numbers<[1], [0], [0], [1], [0, 0, 1, 1], [], []>} : vector<8x128xbf16>, vector<128x256xbf16>, vector<8x256xf32> -> vector<8x256xf32>
    %c0_5 = arith.constant 0 : index
    %c0_6 = arith.constant 0 : index
    %6 = vector.load %arg5[%c0_5, %c0_6] : memref<128x256xbf16, #tpu.memory_space<vmem>>, vector<128x256xbf16>
    %cst_7 = arith.constant dense<0.000000e+00> : vector<8x256xf32>
    %7 = tpu.matmul %2, %6, %cst_7 {dimension_numbers = #tpu.dot_dimension_numbers<[1], [0], [0], [1], [0, 0, 1, 1], [], []>} : vector<8x128xbf16>, vector<128x256xbf16>, vector<8x256xf32> -> vector<8x256xf32>
    %8 = arith.addf %5, %7 : vector<8x256xf32>
    %c0_8 = arith.constant 0 : index
    %c0_9 = arith.constant 0 : index
    %9 = vector.load %arg4[%c0_8, %c0_9] : memref<1x384xf32, #tpu.memory_space<vmem>>, vector<1x256xf32>
    %10 = vector.broadcast %9 : vector<1x256xf32> to vector<8x256xf32>
    %11 = arith.addf %8, %10 : vector<8x256xf32>
    %12 = vector.extract_strided_slice %11 {offsets = [0, 0], sizes = [8, 128], strides = [1, 1]} : vector<8x256xf32> to vector<8x128xf32>
    %cst_10 = arith.constant 0.000000e+00 : f32
    %13 = vector.broadcast %cst_10 : f32 to vector<8x128xf32>
    %14 = arith.subf %13, %12 : vector<8x128xf32>
    %15 = math.exp %14 : vector<8x128xf32>
    %cst_11 = arith.constant 1.000000e+00 : f32
    %16 = vector.broadcast %cst_11 : f32 to vector<8x128xf32>
    %17 = arith.addf %16, %15 : vector<8x128xf32>
    %18 = tpu.reciprocal %17 {approx = true} : vector<8x128xf32> -> vector<8x128xf32>
    %19 = vector.extract_strided_slice %11 {offsets = [0, 128], sizes = [8, 128], strides = [1, 1]} : vector<8x256xf32> to vector<8x128xf32>
    %cst_12 = arith.constant 0.000000e+00 : f32
    %20 = vector.broadcast %cst_12 : f32 to vector<8x128xf32>
    %21 = arith.subf %20, %19 : vector<8x128xf32>
    %22 = math.exp %21 : vector<8x128xf32>
    %cst_13 = arith.constant 1.000000e+00 : f32
    %23 = vector.broadcast %cst_13 : f32 to vector<8x128xf32>
    %24 = arith.addf %23, %22 : vector<8x128xf32>
    %25 = tpu.reciprocal %24 {approx = true} : vector<8x128xf32> -> vector<8x128xf32>
    %c0_14 = arith.constant 0 : index
    %c256 = arith.constant 256 : index
    %26 = vector.load %arg3[%c0_14, %c256] : memref<128x384xbf16, #tpu.memory_space<vmem>>, vector<128x128xbf16>
    %cst_15 = arith.constant dense<0.000000e+00> : vector<8x128xf32>
    %27 = tpu.matmul %3, %26, %cst_15 {dimension_numbers = #tpu.dot_dimension_numbers<[1], [0], [0], [1], [0, 0, 1, 1], [], []>} : vector<8x128xbf16>, vector<128x128xbf16>, vector<8x128xf32> -> vector<8x128xf32>
    %28 = arith.mulf %18, %0 : vector<8x128xf32>
    %29 = arith.truncf %28 : vector<8x128xf32> to vector<8x128xbf16>
    %c0_16 = arith.constant 0 : index
    %c0_17 = arith.constant 0 : index
    %30 = vector.load %arg6[%c0_16, %c0_17] : memref<128x128xbf16, #tpu.memory_space<vmem>>, vector<128x128xbf16>
    %cst_18 = arith.constant dense<0.000000e+00> : vector<8x128xf32>
    %31 = tpu.matmul %29, %30, %cst_18 {dimension_numbers = #tpu.dot_dimension_numbers<[1], [0], [0], [1], [0, 0, 1, 1], [], []>} : vector<8x128xbf16>, vector<128x128xbf16>, vector<8x128xf32> -> vector<8x128xf32>
    %32 = arith.addf %27, %31 : vector<8x128xf32>
    %c0_19 = arith.constant 0 : index
    %c256_20 = arith.constant 256 : index
    %33 = vector.load %arg4[%c0_19, %c256_20] : memref<1x384xf32, #tpu.memory_space<vmem>>, vector<1x128xf32>
    %34 = vector.broadcast %33 : vector<1x128xf32> to vector<8x128xf32>
    %35 = arith.addf %32, %34 : vector<8x128xf32>
    %36 = math.tanh %35 : vector<8x128xf32>
    %37 = arith.subf %36, %0 : vector<8x128xf32>
    %38 = arith.mulf %25, %37 : vector<8x128xf32>
    %39 = arith.addf %0, %38 : vector<8x128xf32>
    %c0_21 = arith.constant 0 : index
    %c0_22 = arith.constant 0 : index
    %40 = vector.load %arg7[%c0_21, %c0_22] : memref<8x128xf32, #tpu.memory_space<vmem>>, vector<8x128xf32>
    tpu.vector_store %arg7[%c0_21, %c0_22], %39 {strides = array<i32>} : memref<8x128xf32, #tpu.memory_space<vmem>>, vector<8x128xf32>,
    return
  }
  func.func @transform_0(%arg0: i32) -> (i32, i32) {
    %c0_i32 = arith.constant 0 : i32
    %c0_i32_0 = arith.constant 0 : i32
    return %arg0, %c0_i32 : i32, i32
  }
  func.func @transform_1(%arg0: i32) -> (i32, i32) {
    %c0_i32 = arith.constant 0 : i32
    %c0_i32_0 = arith.constant 0 : i32
    return %arg0, %c0_i32 : i32, i32
  }
  func.func @transform_2(%arg0: i32) -> (i32, i32) {
    %c0_i32 = arith.constant 0 : i32
    %c0_i32_0 = arith.constant 0 : i32
    %c0_i32_1 = arith.constant 0 : i32
    return %c0_i32, %c0_i32_0 : i32, i32
  }
  func.func @transform_3(%arg0: i32) -> (i32, i32) {
    %c0_i32 = arith.constant 0 : i32
    %c0_i32_0 = arith.constant 0 : i32
    %c0_i32_1 = arith.constant 0 : i32
    return %c0_i32, %c0_i32_0 : i32, i32
  }
  func.func @transform_4(%arg0: i32) -> (i32, i32) {
    %c0_i32 = arith.constant 0 : i32
    %c0_i32_0 = arith.constant 0 : i32
    %c0_i32_1 = arith.constant 0 : i32
    return %c0_i32, %c0_i32_0 : i32, i32
  }
  func.func @transform_5(%arg0: i32) -> (i32, i32) {
    %c0_i32 = arith.constant 0 : i32
    %c0_i32_0 = arith.constant 0 : i32
    %c0_i32_1 = arith.constant 0 : i32
    return %c0_i32, %c0_i32_0 : i32, i32
  }
  func.func @transform_6(%arg0: i32) -> (i32, i32) {
    %c0_i32 = arith.constant 0 : i32
    %c0_i32_0 = arith.constant 0 : i32
    return %arg0, %c0_i32 : i32, i32
  }
}

module attributes {stable_mosaic.version = 11 : i64} {
  func.func @gating_kernel(%arg0: i32, %arg1: memref<8x128xf32, #tpu.memory_space<vmem>>, %arg2: memref<8x128xf32, #tpu.memory_space<vmem>>, %arg3: memref<128x384xbf16, #tpu.memory_space<vmem>>, %arg4: memref<1x384xf32, #tpu.memory_space<vmem>>, %arg5: memref<128x256xbf16, #tpu.memory_space<vmem>>, %arg6: memref<128x128xbf16, #tpu.memory_space<vmem>>, %arg7: memref<8x128xf32, #tpu.memory_space<vmem>>) attributes {dimension_semantics = [#tpu.dimension_semantics<parallel>], iteration_bounds = array<i64: 1>, scalar_prefetch = 0 : i64, scratch_operands = 0 : i64, tpu.core_type = #tpu.core_type<tc>, window_params = [{transform_indices = @transform_0, window_bounds = array<i64: 8, 128>}, {transform_indices = @transform_1, window_bounds = array<i64: 8, 128>}, {pipeline_mode = #tpu.pipeline_mode<synchronous>, transform_indices = @transform_2, window_bounds = array<i64: 128, 384>}, {pipeline_mode = #tpu.pipeline_mode<synchronous>, transform_indices = @transform_3, window_bounds = array<i64: 1, 384>}, {pipeline_mode = #tpu.pipeline_mode<synchronous>, transform_indices = @transform_4, window_bounds = array<i64: 128, 256>}, {pipeline_mode = #tpu.pipeline_mode<synchronous>, transform_indices = @transform_5, window_bounds = array<i64: 128, 128>}, {transform_indices = @transform_6, window_bounds = array<i64: 8, 128>}]} {
    %c0 = arith.constant 0 : index
    %c0_0 = arith.constant 0 : index
    %0 = vector.load %arg1[%c0, %c0_0] : memref<8x128xf32, #tpu.memory_space<vmem>>, vector<8x128xf32>
    %c0_1 = arith.constant 0 : index
    %c0_2 = arith.constant 0 : index
    %1 = vector.load %arg2[%c0_1, %c0_2] : memref<8x128xf32, #tpu.memory_space<vmem>>, vector<8x128xf32>
    %2 = arith.truncf %0 : vector<8x128xf32> to vector<8x128xbf16>
    %3 = arith.truncf %1 : vector<8x128xf32> to vector<8x128xbf16>
    %c0_3 = arith.constant 0 : index
    %c0_4 = arith.constant 0 : index
    %4 = vector.load %arg3[%c0_3, %c0_4] : memref<128x384xbf16, #tpu.memory_space<vmem>>, vector<128x256xbf16>
    %cst = arith.constant dense<0.000000e+00> : vector<8x256xf32>
    %5 = tpu.matmul %3, %4, %cst {dimension_numbers = #tpu.dot_dimension_numbers<[1], [0], [0], [1], [0, 0, 1, 1], [], []>} : vector<8x128xbf16>, vector<128x256xbf16>, vector<8x256xf32> -> vector<8x256xf32>
    %c0_5 = arith.constant 0 : index
    %c0_6 = arith.constant 0 : index
    %6 = vector.load %arg5[%c0_5, %c0_6] : memref<128x256xbf16, #tpu.memory_space<vmem>>, vector<128x256xbf16>
    %cst_7 = arith.constant dense<0.000000e+00> : vector<8x256xf32>
    %7 = tpu.matmul %2, %6, %cst_7 {dimension_numbers = #tpu.dot_dimension_numbers<[1], [0], [0], [1], [0, 0, 1, 1], [], []>} : vector<8x128xbf16>, vector<128x256xbf16>, vector<8x256xf32> -> vector<8x256xf32>
    %8 = arith.addf %5, %7 : vector<8x256xf32>
    %c0_8 = arith.constant 0 : index
    %c0_9 = arith.constant 0 : index
    %9 = vector.load %arg4[%c0_8, %c0_9] : memref<1x384xf32, #tpu.memory_space<vmem>>, vector<1x256xf32>
    %10 = vector.broadcast %9 : vector<1x256xf32> to vector<8x256xf32>
    %11 = arith.addf %8, %10 : vector<8x256xf32>
    %12 = vector.extract_strided_slice %11 {offsets = [0, 0], sizes = [8, 128], strides = [1, 1]} : vector<8x256xf32> to vector<8x128xf32>
    %cst_10 = arith.constant 0.000000e+00 : f32
    %13 = vector.broadcast %cst_10 : f32 to vector<8x128xf32>
    %14 = arith.subf %13, %12 : vector<8x128xf32>
    %15 = math.exp %14 : vector<8x128xf32>
    %cst_11 = arith.constant 1.000000e+00 : f32
    %16 = vector.broadcast %cst_11 : f32 to vector<8x128xf32>
    %17 = arith.addf %16, %15 : vector<8x128xf32>
    %18 = tpu.reciprocal %17 {approx = true} : vector<8x128xf32> -> vector<8x128xf32>
    %19 = vector.extract_strided_slice %11 {offsets = [0, 128], sizes = [8, 128], strides = [1, 1]} : vector<8x256xf32> to vector<8x128xf32>
    %cst_12 = arith.constant 0.000000e+00 : f32
    %20 = vector.broadcast %cst_12 : f32 to vector<8x128xf32>
    %21 = arith.subf %20, %19 : vector<8x128xf32>
    %22 = math.exp %21 : vector<8x128xf32>
    %cst_13 = arith.constant 1.000000e+00 : f32
    %23 = vector.broadcast %cst_13 : f32 to vector<8x128xf32>
    %24 = arith.addf %23, %22 : vector<8x128xf32>
    %25 = tpu.reciprocal %24 {approx = true} : vector<8x128xf32> -> vector<8x128xf32>
    %c0_14 = arith.constant 0 : index
    %c256 = arith.constant 256 : index
    %26 = vector.load %arg3[%c0_14, %c256] : memref<128x384xbf16, #tpu.memory_space<vmem>>, vector<128x128xbf16>
    %cst_15 = arith.constant dense<0.000000e+00> : vector<8x128xf32>
    %27 = tpu.matmul %3, %26, %cst_15 {dimension_numbers = #tpu.dot_dimension_numbers<[1], [0], [0], [1], [0, 0, 1, 1], [], []>} : vector<8x128xbf16>, vector<128x128xbf16>, vector<8x128xf32> -> vector<8x128xf32>
    %28 = arith.mulf %18, %0 : vector<8x128xf32>
    %29 = arith.truncf %28 : vector<8x128xf32> to vector<8x128xbf16>
    %c0_16 = arith.constant 0 : index
    %c0_17 = arith.constant 0 : index
    %30 = vector.load %arg6[%c0_16, %c0_17] : memref<128x128xbf16, #tpu.memory_space<vmem>>, vector<128x128xbf16>
    %cst_18 = arith.constant dense<0.000000e+00> : vector<8x128xf32>
    %31 = tpu.matmul %29, %30, %cst_18 {dimension_numbers = #tpu.dot_dimension_numbers<[1], [0], [0], [1], [0, 0, 1, 1], [], []>} : vector<8x128xbf16>, vector<128x128xbf16>, vector<8x128xf32> -> vector<8x128xf32>
    %32 = arith.addf %27, %31 : vector<8x128xf32>
    %c0_19 = arith.constant 0 : index
    %c256_20 = arith.constant 256 : index
    %33 = vector.load %arg4[%c0_19, %c256_20] : memref<1x384xf32, #tpu.memory_space<vmem>>, vector<1x128xf32>
    %34 = vector.broadcast %33 : vector<1x128xf32> to vector<8x128xf32>
    %35 = arith.addf %32, %34 : vector<8x128xf32>
    %36 = math.tanh %35 : vector<8x128xf32>
    %37 = arith.subf %36, %0 : vector<8x128xf32>
    %38 = arith.mulf %25, %37 : vector<8x128xf32>
    %39 = arith.addf %0, %38 : vector<8x128xf32>
    %c0_21 = arith.constant 0 : index
    %c0_22 = arith.constant 0 : index
    %40 = vector.load %arg7[%c0_21, %c0_22] : memref<8x128xf32, #tpu.memory_space<vmem>>, vector<8x128xf32>
    tpu.vector_store %arg7[%c0_21, %c0_22], %39 {strides = array<i32>} : memref<8x128xf32, #tpu.memory_space<vmem>>, vector<8x128xf32>,
    return
  }
  func.func @transform_0(%arg0: i32) -> (i32, i32) {
    %c0_i32 = arith.constant 0 : i32
    %c0_i32_0 = arith.constant 0 : i32
    return %arg0, %c0_i32 : i32, i32
  }
  func.func @transform_1(%arg0: i32) -> (i32, i32) {
    %c0_i32 = arith.constant 0 : i32
    %c0_i32_0 = arith.constant 0 : i32
    return %arg0, %c0_i32 : i32, i32
  }
  func.func @transform_2(%arg0: i32) -> (i32, i32) {
    %c0_i32 = arith.constant 0 : i32
    %c0_i32_0 = arith.constant 0 : i32
    %c0_i32_1 = arith.constant 0 : i32
    return %c0_i32, %c0_i32_0 : i32, i32
  }
  func.func @transform_3(%arg0: i32) -> (i32, i32) {
    %c0_i32 = arith.constant 0 : i32
    %c0_i32_0 = arith.constant 0 : i32
    %c0_i32_1 = arith.constant 0 : i32
    return %c0_i32, %c0_i32_0 : i32, i32
  }
  func.func @transform_4(%arg0: i32) -> (i32, i32) {
    %c0_i32 = arith.constant 0 : i32
    %c0_i32_0 = arith.constant 0 : i32
    %c0_i32_1 = arith.constant 0 : i32
    return %c0_i32, %c0_i32_0 : i32, i32
  }
  func.func @transform_5(%arg0: i32) -> (i32, i32) {
    %c0_i32 = arith.constant 0 : i32
    %c0_i32_0 = arith.constant 0 : i32
    %c0_i32_1 = arith.constant 0 : i32
    return %c0_i32, %c0_i32_0 : i32, i32
  }
  func.func @transform_6(%arg0: i32) -> (i32, i32) {
    %c0_i32 = arith.constant 0 : i32
    %c0_i32_0 = arith.constant 0 : i32
    return %arg0, %c0_i32 : i32, i32
  }
}

</mosaic_0001>

<bundles_post_ra>
// kernel: tpu_custom_call.1
= control target key start
LH: loop header
LB: loop body
LE: loop exit
PB: predicated region body
PF: predicated region fallthrough
CT: control target
= control target key end

     0   :  { %11 = vsyncpa [#allocation3], 0  ;;  %s1119_s0 = inlined_call_operand.hbm [shape: f32[8,128], index: 0, kind: input, shape index: {}]   ;;  %s1120_s1 = inlined_call_operand.hbm [shape: f32[8,128], index: 1, kind: input, shape index: {}]   ;;  %s1121_s2 = inlined_call_operand.hbm [shape: bf16[128,384], index: 2, kind: input, shape index: {}]   ;;  %s1122_s3 = inlined_call_operand.vmem [shape: f32[1,384], index: 3, kind: input, shape index: {}]   ;;  %s1123_s4 = inlined_call_operand.hbm [shape: bf16[128,256], index: 4, kind: input, shape index: {}]   ;;  %s1124_s5 = inlined_call_operand.hbm [shape: bf16[128,128], index: 5, kind: input, shape index: {}]   ;;  %s1125_s6 = inlined_call_operand.hbm [shape: f32[8,128], index: 6, kind: output, shape index: {}]  }
   0x1   :  { %12 = vsyncpa [#allocation6], 0 }
   0x2   :  { %13 = vsyncpa [#allocation9], 0 }
   0x3   :  { %14 = vsyncpa [#allocation4], 0  ;;  %s967_s21 = smov [#allocation5]   ;;  %s968_s23 = smov [#allocation8]  }
   0x4   :  { %s31_s22 = sshll.u32 %s967_s21, 4  ;;  %s54_s24 = sshll.u32 %s968_s23, 4  ;;  %s32_s22 = int_to_ptr.vmem [resolvable:$true] %s31_s22  ;;  %s1017_s24 = int_to_ptr.vmem [resolvable:$true] %s54_s24 }
   0x5   :  { %s827_s27 = scalar_lea.hbm %s1120_s1, 128 }
   0x6   :  { %p828_p0 = scmp.ne.s32.totalorder %s1120_s1, %s827_s27  ;;  %p831_p1 = scmp.lt.u32.totalorder %s827_s27, %s1120_s1 }
   0x8   :  { %p833_p2 = pnand %p831_p1, %p828_p0 }
   0xa   :  { %836 = shalt.err (!%p833_p2)
}
   0xb   :  { %s837_s8 = scalar_lea.vmem %s32_s22, 128  ;;  %p842_p4 = scmp.lt.s32.totalorder %s32_s22, %s32_s22 }
   0xc   :  { %p838_p3 = scmp.ne.s32.totalorder %s32_s22, %s837_s8  ;;  %p843_p5 = scmp.lt.s32.totalorder %s837_s8, %s837_s8 }
   0xe   :  { %p844_p6 = por %p843_p5, %p842_p4 }
  0x10   :  { %p845_p7 = pnand %p844_p6, %p838_p3 }
  0x12   :  { %848 = shalt.err (!%p845_p7)
}
  0x13   :  { %34 = dma.hbm_to_vmem [thread:$0]  %s1120_s1, 128, %s32_s22, [#allocation6]  }
  0x14   :  { %s849_s13 = scalar_lea.hbm %s1123_s4, 2048 }
  0x15   :  { %p850_p8 = scmp.ne.s32.totalorder %s1123_s4, %s849_s13  ;;  %p853_p9 = scmp.lt.u32.totalorder %s849_s13, %s1123_s4 }
  0x17   :  { %p855_p10 = pnand %p853_p9, %p850_p8 }
  0x19   :  { %858 = shalt.err (!%p855_p10)
}
  0x1a   :  { %s859_s18 = scalar_lea.vmem %s1017_s24, 2048  ;;  %p864_p12 = scmp.lt.s32.totalorder %s1017_s24, %s1017_s24 }
  0x1b   :  { %p860_p11 = scmp.ne.s32.totalorder %s1017_s24, %s859_s18  ;;  %p865_p13 = scmp.lt.s32.totalorder %s859_s18, %s859_s18 }
  0x1d   :  { %p866_p0 = por %p865_p13, %p864_p12 }
  0x1f   :  { %p867_p1 = pnand %p866_p0, %p860_p11 }
  0x21   :  { %870 = shalt.err (!%p867_p1)
}
  0x22   :  { %s969_s1 = smov 128   ;;  %s970_s19 = smov 8  }
  0x23   :  { %60 = dma.hbm_to_vmem [thread:$0]  %s1123_s4, 2048, %s1017_s24, [#allocation9], %s969_s1, %s969_s1, %s970_s19  }
  0x24   :  { %s971_s22 = smov [#allocation2]   ;;  %s972_s25 = smov [#allocation7]  }
  0x25   :  { %s21_s23 = sshll.u32 %s971_s22, 4  ;;  %s40_s26 = sshll.u32 %s972_s25, 4  ;;  %s22_s23 = int_to_ptr.vmem [resolvable:$true] %s21_s23  ;;  %s1048_s26 = int_to_ptr.vmem [resolvable:$true] %s40_s26 }
  0x26   :  { %s871_s29 = scalar_lea.hbm %s1119_s0, 128 }
  0x27   :  { %p872_p2 = scmp.ne.s32.totalorder %s1119_s0, %s871_s29  ;;  %p875_p3 = scmp.lt.u32.totalorder %s871_s29, %s1119_s0 }
  0x29   :  { %p877_p4 = pnand %p875_p3, %p872_p2 }
  0x2b   :  { %880 = shalt.err (!%p877_p4)
}
  0x2c   :  { %s881_s4 = scalar_lea.vmem %s22_s23, 128  ;;  %p886_p6 = scmp.lt.s32.totalorder %s22_s23, %s22_s23 }
  0x2d   :  { %p882_p5 = scmp.ne.s32.totalorder %s22_s23, %s881_s4  ;;  %p887_p7 = scmp.lt.s32.totalorder %s881_s4, %s881_s4 }
  0x2f   :  { %p888_p8 = por %p887_p7, %p886_p6 }
  0x31   :  { %p889_p9 = pnand %p888_p8, %p882_p5 }
  0x33   :  { %892 = shalt.err (!%p889_p9)
}
  0x34   :  { %24 = dma.hbm_to_vmem [thread:$0]  %s1119_s0, 128, %s22_s23, [#allocation3]  }
  0x35   :  { %s893_s13 = scalar_lea.hbm %s1121_s2, 3072 }
  0x36   :  { %p894_p10 = scmp.ne.s32.totalorder %s1121_s2, %s893_s13  ;;  %p897_p11 = scmp.lt.u32.totalorder %s893_s13, %s1121_s2 }
  0x38   :  { %p899_p12 = pnand %p897_p11, %p894_p10 }
  0x3a   :  { %902 = shalt.err (!%p899_p12)
}
  0x3b   :  { %s903_s18 = scalar_lea.vmem %s1048_s26, 3072  ;;  %p908_p0 = scmp.lt.s32.totalorder %s1048_s26, %s1048_s26 }
  0x3c   :  { %p904_p13 = scmp.ne.s32.totalorder %s1048_s26, %s903_s18  ;;  %p909_p1 = scmp.lt.s32.totalorder %s903_s18, %s903_s18 }
  0x3e   :  { %p910_p2 = por %p909_p1, %p908_p0 }
  0x40   :  { %p911_p3 = pnand %p910_p2, %p904_p13 }
  0x42   :  { %914 = shalt.err (!%p911_p3)
}
  0x43   :  { %s973_s0 = smov 192   ;;  %s974_s1 = smov 12  }
  0x44   :  { %46 = dma.hbm_to_vmem [thread:$0]  %s1121_s2, 3072, %s1048_s26, [#allocation6], %s973_s0, %s973_s0, %s974_s1  }
  0x45   :  { %s975_s21 = smov [#allocation10]   ;;  %s915_s27 = scalar_lea.hbm %s1124_s5, 1024 }
  0x46   :  { %s66_s22 = sshll.u32 %s975_s21, 4  ;;  %p916_p4 = scmp.ne.s32.totalorder %s1124_s5, %s915_s27  ;;  %s67_s22 = int_to_ptr.vmem [resolvable:$true] %s66_s22 }
  0x47   :  { %p919_p5 = scmp.lt.u32.totalorder %s915_s27, %s1124_s5 }
  0x49   :  { %p921_p6 = pnand %p919_p5, %p916_p4 }
  0x4b   :  { %924 = shalt.err (!%p921_p6)
}
  0x4c   :  { %s925_s8 = scalar_lea.vmem %s67_s22, 1024  ;;  %p930_p8 = scmp.lt.s32.totalorder %s67_s22, %s67_s22 }
  0x4d   :  { %p926_p7 = scmp.ne.s32.totalorder %s67_s22, %s925_s8  ;;  %p931_p9 = scmp.lt.s32.totalorder %s925_s8, %s925_s8 }
  0x4f   :  { %p932_p10 = por %p931_p9, %p930_p8 }
  0x51   :  { %p933_p11 = pnand %p932_p10, %p926_p7 }
  0x53   :  { %936 = shalt.err (!%p933_p11)
}
  0x54   :  { %s976_s2 = smov 64   ;;  %s977_s26 = smov 4  }
  0x55   :  { %72 = dma.hbm_to_vmem [thread:$0]  %s1124_s5, 1024, %s67_s22, [#allocation9], %s976_s2, %s976_s2, %s977_s26  }
  0x56   :  { %959 = dma.done.wait [#allocation3], 128  }
  0x57   :  { %960 = vsyncadd [#allocation3], 4294967168 }
  0x58   :  { %961 = dma.done.wait [#allocation6], 3200  }
  0x59   :  { %962 = vsyncadd [#allocation6], 4294964096 }
  0x5a   :  { %963 = dma.done.wait [#allocation9], 3072  }
  0x5b   :  { %964 = vsyncadd [#allocation9], 4294964224  ;;  %v978_v0 = vmov 0   ;;  %v753_v1 = vld [vmem:[#allocation8 + $0x4] ss:$8 sps:$4 sm:$0xff]   ;;  %v1091_v33 = vld [vmem:[#allocation2] sm:$0xff]  ;;  %v369_v37 = vlaneseq }
  0x5c   :  { %237 = vmatprep.mubr.bf16.mxu0 %v978_v0  ;;  %358 = vmatprep.mubr.bf16.mxu1 %v978_v0  ;;  %v755_v2 = vld [vmem:[#allocation7 + $0x4] ss:$12 sps:$4 sm:$0xff]   ;;  %v757_v3 = vld [vmem:[#allocation8] ss:$8 sps:$4 sm:$0xff]   ;;  %v759_v5 = vld [vmem:[#allocation8 + $0x14] ss:$8 sps:$4 sm:$0xff]   ;;  %v91_v35 = vpack.c.bf16 %v1091_v33, %v1091_v33 }
  0x5d   :  { %205 = vmatprep.subr.bf16.mxu0 %v753_v1  ;;  %v758_v4 = vld [vmem:[#allocation7] ss:$12 sps:$4 sm:$0xff]   ;;  %326 = vmatprep.subr.bf16.mxu1 %v755_v2  ;;  %v761_v6 = vld [vmem:[#allocation7 + $0x1c] ss:$12 sps:$4 sm:$0xff]   ;;  %v763_v7 = vld [vmem:[#allocation8 + $0x10] ss:$8 sps:$4 sm:$0xff]  }
  0x5e   :  { %206 = vmatpush1.bf16.msra.mxu0 %v757_v3  ;;  %327 = vmatpush1.bf16.msra.mxu1 %v758_v4  ;;  %v764_v8 = vld [vmem:[#allocation7 + $0x18] ss:$12 sps:$4 sm:$0xff]   ;;  %v767_v10 = vld [vmem:[#allocation7 + $0x34] ss:$12 sps:$4 sm:$0xff]   ;;  %v770_v12 = vld [vmem:[#allocation7 + $0x30] ss:$12 sps:$4 sm:$0xff]  }
  0x5f   :  { %207 = vmatprep.subr.bf16.mxu0 %v759_v5  ;;  %328 = vmatprep.subr.bf16.mxu1 %v761_v6  ;;  %v765_v9 = vld [vmem:[#allocation8 + $0x24] ss:$8 sps:$4 sm:$0xff]   ;;  %v769_v11 = vld [vmem:[#allocation8 + $0x20] ss:$8 sps:$4 sm:$0xff]   ;;  %v771_v13 = vld [vmem:[#allocation8 + $0x34] ss:$8 sps:$4 sm:$0xff]  }
  0x60   :  { %v773_v14 = vld [vmem:[#allocation7 + $0x4c] ss:$12 sps:$4 sm:$0xff]   ;;  %v776_v16 = vld [vmem:[#allocation7 + $0x48] ss:$12 sps:$4 sm:$0xff]   ;;  %v779_v18 = vld [vmem:[#allocation7 + $0x64] ss:$12 sps:$4 sm:$0xff]  }
  0x61   :  { %v775_v15 = vld [vmem:[#allocation8 + $0x30] ss:$8 sps:$4 sm:$0xff]   ;;  %v777_v17 = vld [vmem:[#allocation8 + $0x44] ss:$8 sps:$4 sm:$0xff]   ;;  %v781_v19 = vld [vmem:[#allocation8 + $0x40] ss:$8 sps:$4 sm:$0xff]  }
  0x62   :  { %208 = vmatpush1.bf16.msra.mxu0 %v763_v7  ;;  %329 = vmatpush1.bf16.msra.mxu1 %v764_v8  ;;  %v782_v20 = vld [vmem:[#allocation7 + $0x60] ss:$12 sps:$4 sm:$0xff]   ;;  %v783_v21 = vld [vmem:[#allocation8 + $0x54] ss:$8 sps:$4 sm:$0xff]   ;;  %v787_v23 = vld [vmem:[#allocation8 + $0x50] ss:$8 sps:$4 sm:$0xff]  }
  0x63   :  { %209 = vmatprep.subr.bf16.mxu0 %v765_v9  ;;  %330 = vmatprep.subr.bf16.mxu1 %v767_v10  ;;  %v785_v22 = vld [vmem:[#allocation7 + $0x7c] ss:$12 sps:$4 sm:$0xff]   ;;  %v788_v24 = vld [vmem:[#allocation7 + $0x78] ss:$12 sps:$4 sm:$0xff]   ;;  %v791_v26 = vld [vmem:[#allocation7 + $0x94] ss:$12 sps:$4 sm:$0xff]  }
  0x64   :  { %v789_v25 = vld [vmem:[#allocation8 + $0x64] ss:$8 sps:$4 sm:$0xff]   ;;  %v793_v27 = vld [vmem:[#allocation8 + $0x60] ss:$8 sps:$4 sm:$0xff]   ;;  %v794_v28 = vld [vmem:[#allocation7 + $0x90] ss:$12 sps:$4 sm:$0xff]  }
  0x65   :  { %v795_v29 = vld [vmem:[#allocation8 + $0x74] ss:$8 sps:$4 sm:$0xff]   ;;  %v797_v30 = vld [vmem:[#allocation7 + $0xac] ss:$12 sps:$4 sm:$0xff]   ;;  %v370_v38 = vshrl.u32 %v369_v37, 7  ;;  %v979_v43 = vmov 0.0  }
  0x66   :  { %210 = vmatpush1.bf16.msra.mxu0 %v769_v11  ;;  %331 = vmatpush1.bf16.msra.mxu1 %v770_v12  ;;  %v799_v31 = vld [vmem:[#allocation8 + $0x70] ss:$8 sps:$4 sm:$0xff]   ;;  %v800_v32 = vld [vmem:[#allocation7 + $0xa8] ss:$12 sps:$4 sm:$0xff]   ;;  %v802_v44 = vld [vmem:[#allocation10] sm:$0xff]   ;;  %vm980_vm0 = vmmov 0  }
  0x67   :  { %211 = vmatprep.subr.bf16.mxu0 %v771_v13  ;;  %332 = vmatprep.subr.bf16.mxu1 %v773_v14  ;;  %v90_v34 = vld [vmem:[#allocation5] sm:$0xff]  ;;  %v367_v39 = vld [vmem:[%s1122_s3] sm:$0x3]  ;;  %v375_v40 = vsub.s32 1, %v370_v38  ;;  %v801_v41 = vld [vmem:[#allocation7 + $0x8] ss:$12 sps:$4 sm:$0xff]  }
  0x68   :  { %v92_v36 = vpack.c.bf16 %v90_v34, %v90_v34  ;;  %v803_v45 = vld [vmem:[#allocation7 + $0x20] ss:$12 sps:$4 sm:$0xff]   ;;  %v805_v47 = vld [vmem:[#allocation7 + $0x38] ss:$12 sps:$4 sm:$0xff]   ;;  %v806_v48 = vld [vmem:[#allocation10 + $0x10] sm:$0xff]   ;;  %v371_v59 = vsub.s32 0, %v370_v38 }
  0x69   :  { %v1098_v42 = vrot.slane %v367_v39, %v375_v40  ;;  %v804_v46 = vld [vmem:[#allocation10 + $0x8] sm:$0xff]   ;;  %v807_v49 = vld [vmem:[#allocation7 + $0x50] ss:$12 sps:$4 sm:$0xff]   ;;  %v810_v52 = vld [vmem:[#allocation10 + $0x20] sm:$0xff]   ;;  %s981_s12 = smov [#allocation11]  }
  0x6a   :  { %212 = vmatpush1.bf16.msra.mxu0 %v775_v15  ;;  %333 = vmatpush1.bf16.msra.mxu1 %v776_v16  ;;  %v808_v50 = vld [vmem:[#allocation10 + $0x18] sm:$0xff]   ;;  %v809_v51 = vld [vmem:[#allocation7 + $0x68] ss:$12 sps:$4 sm:$0xff]   ;;  %v811_v53 = vld [vmem:[#allocation7 + $0x80] ss:$12 sps:$4 sm:$0xff]   ;;  %v372_v60 = vrot.slane %v367_v39, %v371_v59  ;;  %s620_s13 = sshll.u32 %s981_s12, 4  ;;  %s621_s13 = int_to_ptr.vmem [resolvable:$true] %s620_s13 }
  0x6b   :  { %213 = vmatprep.subr.bf16.mxu0 %v777_v17  ;;  %334 = vmatprep.subr.bf16.mxu1 %v779_v18  ;;  %v812_v54 = vld [vmem:[#allocation10 + $0x28] sm:$0xff]   ;;  %v813_v55 = vld [vmem:[#allocation7 + $0x98] ss:$12 sps:$4 sm:$0xff]   ;;  %v814_v56 = vld [vmem:[#allocation10 + $0x30] sm:$0xff]   ;;  %p942_p13 = scmp.lt.s32.totalorder %s621_s13, %s621_s13 }
  0x6c   :  { %v815_v57 = vld [vmem:[#allocation7 + $0xb0] ss:$12 sps:$4 sm:$0xff]  }
  0x6d   :  { %v816_v58 = vld [vmem:[#allocation10 + $0x38] sm:$0xff]  }
  0x6e   :  { %214 = vmatpush1.bf16.msra.mxu0 %v781_v19  ;;  %335 = vmatpush1.bf16.msra.mxu1 %v782_v20 }
  0x6f   :  { %215 = vmatprep.subr.bf16.mxu0 %v783_v21  ;;  %336 = vmatprep.subr.bf16.mxu1 %v785_v22 }
  0x72   :  { %216 = vmatpush1.bf16.msra.mxu0 %v787_v23  ;;  %337 = vmatpush1.bf16.msra.mxu1 %v788_v24  ;;  %v679_v24 = vld [vmem:[%s1122_s3 + $0x2] ss:$0 sm:$0xff]  ;;  %s937_s3 = scalar_lea.vmem %s621_s13, 128 }
  0x73   :  { %217 = vmatprep.subr.bf16.mxu0 %v789_v25  ;;  %338 = vmatprep.subr.bf16.mxu1 %v791_v26  ;;  %p938_p12 = scmp.ne.s32.totalorder %s621_s13, %s937_s3  ;;  %p943_p0 = scmp.lt.s32.totalorder %s937_s3, %s937_s3 }
  0x75   :  { %p944_p1 = por %p943_p0, %p942_p13 }
  0x76   :  { %218 = vmatpush1.bf16.msra.mxu0 %v793_v27  ;;  %339 = vmatpush1.bf16.msra.mxu1 %v794_v28 }
  0x77   :  { %219 = vmatprep.subr.bf16.mxu0 %v795_v29  ;;  %340 = vmatprep.subr.bf16.mxu1 %v797_v30  ;;  %p945_p2 = pnand %p944_p1, %p938_p12 }
  0x7a   :  { %220 = vmatpush1.bf16.msra.mxu0 %v799_v31  ;;  %341 = vmatpush1.bf16.msra.mxu1 %v800_v32 }
  0x7b   :  { %718 = vmatprep.subr.bf16.mxu1 %v979_v43  ;;  %698 = vmatprep.subr.bf16.mxu0 %v979_v43 }
  0x7d   :  { %238 = vmatmul.mubr.bf16.vlgmr.msra.gmra.mrb[0].mxu0 %v91_v35  ;;  %359 = vmatmul.mubr.bf16.vlgmr.msra.gmra.mrb[0].mxu1 %v92_v36 }
  0x7e   :  { %719 = vmatpush3.bf16.msra.mxu1 %v801_v41  ;;  %699 = vmatpush3.bf16.msra.mxu0 %v802_v44 }
  0x7f   :  { %720 = vmatprep.subr.bf16.mxu1 %v979_v43  ;;  %700 = vmatprep.subr.bf16.mxu0 %v979_v43 }
  0x80   :  { %734 = vmatprep.mubr.msk.bf16.mxu1 %vm980_vm0, %v979_v43  ;;  %714 = vmatprep.mubr.msk.bf16.mxu0 %vm980_vm0, %v979_v43 }
  0x82   :  { %721 = vmatpush3.bf16.msra.mxu1 %v803_v45  ;;  %701 = vmatpush3.bf16.msra.mxu0 %v804_v46 }
  0x83   :  { %722 = vmatprep.subr.bf16.mxu1 %v979_v43  ;;  %702 = vmatprep.subr.bf16.mxu0 %v979_v43 }
  0x86   :  { %723 = vmatpush3.bf16.msra.mxu1 %v805_v47  ;;  %703 = vmatpush3.bf16.msra.mxu0 %v806_v48 }
  0x87   :  { %724 = vmatprep.subr.bf16.mxu1 %v979_v43  ;;  %704 = vmatprep.subr.bf16.mxu0 %v979_v43 }
  0x8a   :  { %725 = vmatpush3.bf16.msra.mxu1 %v807_v49  ;;  %705 = vmatpush3.bf16.msra.mxu0 %v808_v50 }
  0x8b   :  { %726 = vmatprep.subr.bf16.mxu1 %v979_v43  ;;  %706 = vmatprep.subr.bf16.mxu0 %v979_v43 }
  0x8e   :  { %727 = vmatpush3.bf16.msra.mxu1 %v809_v51  ;;  %707 = vmatpush3.bf16.msra.mxu0 %v810_v52 }
  0x8f   :  { %728 = vmatprep.subr.bf16.mxu1 %v979_v43  ;;  %708 = vmatprep.subr.bf16.mxu0 %v979_v43 }
  0x92   :  { %729 = vmatpush3.bf16.msra.mxu1 %v811_v53  ;;  %709 = vmatpush3.bf16.msra.mxu0 %v812_v54 }
  0x93   :  { %730 = vmatprep.subr.bf16.mxu1 %v979_v43  ;;  %710 = vmatprep.subr.bf16.mxu0 %v979_v43 }
  0x96   :  { %731 = vmatpush3.bf16.msra.mxu1 %v813_v55  ;;  %711 = vmatpush3.bf16.msra.mxu0 %v814_v56 }
  0x97   :  { %732 = vmatprep.subr.bf16.mxu1 %v979_v43  ;;  %712 = vmatprep.subr.bf16.mxu0 %v979_v43 }
  0x9a   :  { %733 = vmatpush3.bf16.msra.mxu1 %v815_v57  ;;  %713 = vmatpush3.bf16.msra.mxu0 %v816_v58 }
  0x9d   :  { %735 = vmatmul.mubr.bf16.vlgmr.msra.gmra.mrb[4].mxu1 %v92_v36 }
 0x150   :  { %v239_v61 = vpop.f32.mrb[0].mxu0  ;;  %v360_v62 = vpop.f32.mrb[0].mxu1 }
 0x151   :  { %v361_v63 = vadd.f32 %v360_v62, %v239_v61  ;;  %v241_v0 = vpop.f32.mrb[1].mxu0  ;;  %v362_v1 = vpop.f32.mrb[1].mxu1 }
 0x152   :  { %v363_v2 = vadd.f32 %v362_v1, %v241_v0  ;;  %v243_v3 = vpop.f32.mrb[2].mxu0  ;;  %v364_v4 = vpop.f32.mrb[2].mxu1 }
 0x153   :  { %v379_v5 = vadd.f32 %v372_v60, %v361_v63  ;;  %v244_v6 = vpop.f32.mrb[3].mxu0  ;;  %v365_v7 = vpop.f32.mrb[3].mxu1 }
 0x154   :  { %v380_v8 = vadd.f32 %v1098_v42, %v363_v2 }
 0x155   :  { %v381_v9 = vsub.f32 0.0, %v379_v5 }
 0x156   :  { %v386_v20 = vsub.f32 0.0, %v380_v8 }
 0x157   :  { %v382_v10 = vmul.f32 1.442695, %v381_v9 }
 0x158   :  { %v387_v21 = vmul.f32 1.442695, %v386_v20 }
 0x159   :  { %817 = vpow2.f32 %v382_v10 }
 0x163   :  { %v818_v11 = vpop.eup %817 }
 0x164   :  { %v384_v12 = vadd.f32 1.0, %v818_v11 }
 0x166   :  { %819 = vrcp.f32 %v384_v12 }
 0x167   :  { %821 = vpow2.f32 %v387_v21 }
 0x170   :  { %v820_v13 = vpop.eup %819  ;;  %v595_v16 = vpop.f32.mrb[4].mxu1 }
 0x171   :  { %v407_v14 = vmul.f32 %v820_v13, %v1091_v33  ;;  %v736_v17 = vpop.f32.mrb[5].mxu1  ;;  %v822_v22 = vpop.eup %821 }
 0x172   :  { %v598_v18 = vpop.f32.mrb[6].mxu1  ;;  %v389_v28 = vadd.f32 1.0, %v822_v22 }
 0x173   :  { %v408_v15 = vpack.c.bf16 %v407_v14, %v407_v14  ;;  %v737_v19 = vpop.f32.mrb[7].mxu1 }
 0x175   :  { %715 = vmatmul.mubr.bf16.vlgmr.msra.gmra.mrb[4].mxu0 %v408_v15 }
 0x248   :  { %v507_v23 = vpop.f32.mrb[4].mxu0 }
 0x249   :  { %v596_v25 = vadd.f32 %v595_v16, %v507_v23  ;;  %v716_v26 = vpop.f32.mrb[5].mxu0 }
 0x24a   :  { %v510_v27 = vpop.f32.mrb[6].mxu0 }
 0x24b   :  { %v608_v29 = vadd.f32 %v679_v24, %v596_v25  ;;  %v717_v30 = vpop.f32.mrb[7].mxu0 }
 0x24d   :  { %823 = vtanh.f32 %v608_v29 }
 0x24e   :  { %825 = vrcp.f32 %v389_v28 }
 0x257   :  { %v824_v31 = vpop.eup %823 }
 0x258   :  { %v610_v32 = vsub.f32 %v824_v31, %v1091_v33  ;;  %v826_v34 = vpop.eup %825 }
 0x25a   :  { %v611_v35 = vmul.f32 %v826_v34, %v610_v32 }
 0x25c   :  { %v612_v36 = vadd.f32 %v611_v35, %v1091_v33 }
 0x25e   :  { %613 = vst [vmem:[#allocation11] sm:$0xff] %v612_v36 }
 0x25f   :  { %948 = shalt.err (!%p945_p2)
}
 0x260   :  { %s949_s16 = scalar_lea.hbm %s1125_s6, 128 }
 0x261   :  { %p950_p3 = scmp.ne.s32.totalorder %s1125_s6, %s949_s16  ;;  %p953_p4 = scmp.lt.u32.totalorder %s949_s16, %s1125_s6 }
 0x263   :  { %p955_p5 = pnand %p953_p4, %p950_p3 }
 0x265   :  { %958 = shalt.err (!%p955_p5)
}
 0x266   :  { %623 = dma.vmem_to_hbm [thread:$0]  %s621_s13, 128, %s1125_s6, [#allocation4]  }
 0x267   :  { %965 = dma.done.wait [#allocation4], 128  }
 0x268   :  { %966 = vsyncadd [#allocation4], 4294967168 }
 0x269   :  { %627 = vsyncpa [#allocation3], 1 }
 0x26a   :  { %628 = vsyncpa [#allocation6], 1 }
 0x26b   :  { %629 = vsyncpa [#allocation9], 1 }
 0x26c   :  { %630 = vsyncpa [#allocation4], 1 }

// kernel: tpu_custom_call.1
= control target key start
LH: loop header
LB: loop body
LE: loop exit
PB: predicated region body
PF: predicated region fallthrough
CT: control target
= control target key end

     0   :  { %11 = vsyncpa [#allocation3], 0  ;;  %s1119_s0 = inlined_call_operand.hbm [shape: f32[8,128], index: 0, kind: input, shape index: {}]   ;;  %s1120_s1 = inlined_call_operand.hbm [shape: f32[8,128], index: 1, kind: input, shape index: {}]   ;;  %s1121_s2 = inlined_call_operand.hbm [shape: bf16[128,384], index: 2, kind: input, shape index: {}]   ;;  %s1122_s3 = inlined_call_operand.vmem [shape: f32[1,384], index: 3, kind: input, shape index: {}]   ;;  %s1123_s4 = inlined_call_operand.hbm [shape: bf16[128,256], index: 4, kind: input, shape index: {}]   ;;  %s1124_s5 = inlined_call_operand.hbm [shape: bf16[128,128], index: 5, kind: input, shape index: {}]   ;;  %s1125_s6 = inlined_call_operand.hbm [shape: f32[8,128], index: 6, kind: output, shape index: {}]  }
   0x1   :  { %12 = vsyncpa [#allocation6], 0 }
   0x2   :  { %13 = vsyncpa [#allocation9], 0 }
   0x3   :  { %14 = vsyncpa [#allocation4], 0  ;;  %s967_s21 = smov [#allocation5]   ;;  %s968_s23 = smov [#allocation8]  }
   0x4   :  { %s31_s22 = sshll.u32 %s967_s21, 4  ;;  %s54_s24 = sshll.u32 %s968_s23, 4  ;;  %s32_s22 = int_to_ptr.vmem [resolvable:$true] %s31_s22  ;;  %s1017_s24 = int_to_ptr.vmem [resolvable:$true] %s54_s24 }
   0x5   :  { %s827_s27 = scalar_lea.hbm %s1120_s1, 128 }
   0x6   :  { %p828_p0 = scmp.ne.s32.totalorder %s1120_s1, %s827_s27  ;;  %p831_p1 = scmp.lt.u32.totalorder %s827_s27, %s1120_s1 }
   0x8   :  { %p833_p2 = pnand %p831_p1, %p828_p0 }
   0xa   :  { %836 = shalt.err (!%p833_p2)
}
   0xb   :  { %s837_s8 = scalar_lea.vmem %s32_s22, 128  ;;  %p842_p4 = scmp.lt.s32.totalorder %s32_s22, %s32_s22 }
   0xc   :  { %p838_p3 = scmp.ne.s32.totalorder %s32_s22, %s837_s8  ;;  %p843_p5 = scmp.lt.s32.totalorder %s837_s8, %s837_s8 }
   0xe   :  { %p844_p6 = por %p843_p5, %p842_p4 }
  0x10   :  { %p845_p7 = pnand %p844_p6, %p838_p3 }
  0x12   :  { %848 = shalt.err (!%p845_p7)
}
  0x13   :  { %34 = dma.hbm_to_vmem [thread:$0]  %s1120_s1, 128, %s32_s22, [#allocation6]  }
  0x14   :  { %s849_s13 = scalar_lea.hbm %s1123_s4, 2048 }
  0x15   :  { %p850_p8 = scmp.ne.s32.totalorder %s1123_s4, %s849_s13  ;;  %p853_p9 = scmp.lt.u32.totalorder %s849_s13, %s1123_s4 }
  0x17   :  { %p855_p10 = pnand %p853_p9, %p850_p8 }
  0x19   :  { %858 = shalt.err (!%p855_p10)
}
  0x1a   :  { %s859_s18 = scalar_lea.vmem %s1017_s24, 2048  ;;  %p864_p12 = scmp.lt.s32.totalorder %s1017_s24, %s1017_s24 }
  0x1b   :  { %p860_p11 = scmp.ne.s32.totalorder %s1017_s24, %s859_s18  ;;  %p865_p13 = scmp.lt.s32.totalorder %s859_s18, %s859_s18 }
  0x1d   :  { %p866_p0 = por %p865_p13, %p864_p12 }
  0x1f   :  { %p867_p1 = pnand %p866_p0, %p860_p11 }
  0x21   :  { %870 = shalt.err (!%p867_p1)
}
  0x22   :  { %s969_s1 = smov 128   ;;  %s970_s19 = smov 8  }
  0x23   :  { %60 = dma.hbm_to_vmem [thread:$0]  %s1123_s4, 2048, %s1017_s24, [#allocation9], %s969_s1, %s969_s1, %s970_s19  }
  0x24   :  { %s971_s22 = smov [#allocation2]   ;;  %s972_s25 = smov [#allocation7]  }
  0x25   :  { %s21_s23 = sshll.u32 %s971_s22, 4  ;;  %s40_s26 = sshll.u32 %s972_s25, 4  ;;  %s22_s23 = int_to_ptr.vmem [resolvable:$true] %s21_s23  ;;  %s1048_s26 = int_to_ptr.vmem [resolvable:$true] %s40_s26 }
  0x26   :  { %s871_s29 = scalar_lea.hbm %s1119_s0, 128 }
  0x27   :  { %p872_p2 = scmp.ne.s32.totalorder %s1119_s0, %s871_s29  ;;  %p875_p3 = scmp.lt.u32.totalorder %s871_s29, %s1119_s0 }
  0x29   :  { %p877_p4 = pnand %p875_p3, %p872_p2 }
  0x2b   :  { %880 = shalt.err (!%p877_p4)
}
  0x2c   :  { %s881_s4 = scalar_lea.vmem %s22_s23, 128  ;;  %p886_p6 = scmp.lt.s32.totalorder %s22_s23, %s22_s23 }
  0x2d   :  { %p882_p5 = scmp.ne.s32.totalorder %s22_s23, %s881_s4  ;;  %p887_p7 = scmp.lt.s32.totalorder %s881_s4, %s881_s4 }
  0x2f   :  { %p888_p8 = por %p887_p7, %p886_p6 }
  0x31   :  { %p889_p9 = pnand %p888_p8, %p882_p5 }
  0x33   :  { %892 = shalt.err (!%p889_p9)
}
  0x34   :  { %24 = dma.hbm_to_vmem [thread:$0]  %s1119_s0, 128, %s22_s23, [#allocation3]  }
  0x35   :  { %s893_s13 = scalar_lea.hbm %s1121_s2, 3072 }
  0x36   :  { %p894_p10 = scmp.ne.s32.totalorder %s1121_s2, %s893_s13  ;;  %p897_p11 = scmp.lt.u32.totalorder %s893_s13, %s1121_s2 }
  0x38   :  { %p899_p12 = pnand %p897_p11, %p894_p10 }
  0x3a   :  { %902 = shalt.err (!%p899_p12)
}
  0x3b   :  { %s903_s18 = scalar_lea.vmem %s1048_s26, 3072  ;;  %p908_p0 = scmp.lt.s32.totalorder %s1048_s26, %s1048_s26 }
  0x3c   :  { %p904_p13 = scmp.ne.s32.totalorder %s1048_s26, %s903_s18  ;;  %p909_p1 = scmp.lt.s32.totalorder %s903_s18, %s903_s18 }
  0x3e   :  { %p910_p2 = por %p909_p1, %p908_p0 }
  0x40   :  { %p911_p3 = pnand %p910_p2, %p904_p13 }
  0x42   :  { %914 = shalt.err (!%p911_p3)
}
  0x43   :  { %s973_s0 = smov 192   ;;  %s974_s1 = smov 12  }
  0x44   :  { %46 = dma.hbm_to_vmem [thread:$0]  %s1121_s2, 3072, %s1048_s26, [#allocation6], %s973_s0, %s973_s0, %s974_s1  }
  0x45   :  { %s975_s21 = smov [#allocation10]   ;;  %s915_s27 = scalar_lea.hbm %s1124_s5, 1024 }
  0x46   :  { %s66_s22 = sshll.u32 %s975_s21, 4  ;;  %p916_p4 = scmp.ne.s32.totalorder %s1124_s5, %s915_s27  ;;  %s67_s22 = int_to_ptr.vmem [resolvable:$true] %s66_s22 }
  0x47   :  { %p919_p5 = scmp.lt.u32.totalorder %s915_s27, %s1124_s5 }
  0x49   :  { %p921_p6 = pnand %p919_p5, %p916_p4 }
  0x4b   :  { %924 = shalt.err (!%p921_p6)
}
  0x4c   :  { %s925_s8 = scalar_lea.vmem %s67_s22, 1024  ;;  %p930_p8 = scmp.lt.s32.totalorder %s67_s22, %s67_s22 }
  0x4d   :  { %p926_p7 = scmp.ne.s32.totalorder %s67_s22, %s925_s8  ;;  %p931_p9 = scmp.lt.s32.totalorder %s925_s8, %s925_s8 }
  0x4f   :  { %p932_p10 = por %p931_p9, %p930_p8 }
  0x51   :  { %p933_p11 = pnand %p932_p10, %p926_p7 }
  0x53   :  { %936 = shalt.err (!%p933_p11)
}
  0x54   :  { %s976_s2 = smov 64   ;;  %s977_s26 = smov 4  }
  0x55   :  { %72 = dma.hbm_to_vmem [thread:$0]  %s1124_s5, 1024, %s67_s22, [#allocation9], %s976_s2, %s976_s2, %s977_s26  }
  0x56   :  { %959 = dma.done.wait [#allocation3], 128  }
  0x57   :  { %960 = vsyncadd [#allocation3], 4294967168 }
  0x58   :  { %961 = dma.done.wait [#allocation6], 3200  }
  0x59   :  { %962 = vsyncadd [#allocation6], 4294964096 }
  0x5a   :  { %963 = dma.done.wait [#allocation9], 3072  }
  0x5b   :  { %964 = vsyncadd [#allocation9], 4294964224  ;;  %v978_v0 = vmov 0   ;;  %v753_v1 = vld [vmem:[#allocation8 + $0x4] ss:$8 sps:$4 sm:$0xff]   ;;  %v1091_v33 = vld [vmem:[#allocation2] sm:$0xff]  ;;  %v369_v37 = vlaneseq }
  0x5c   :  { %237 = vmatprep.mubr.bf16.mxu0 %v978_v0  ;;  %358 = vmatprep.mubr.bf16.mxu1 %v978_v0  ;;  %v755_v2 = vld [vmem:[#allocation7 + $0x4] ss:$12 sps:$4 sm:$0xff]   ;;  %v757_v3 = vld [vmem:[#allocation8] ss:$8 sps:$4 sm:$0xff]   ;;  %v759_v5 = vld [vmem:[#allocation8 + $0x14] ss:$8 sps:$4 sm:$0xff]   ;;  %v91_v35 = vpack.c.bf16 %v1091_v33, %v1091_v33 }
  0x5d   :  { %205 = vmatprep.subr.bf16.mxu0 %v753_v1  ;;  %v758_v4 = vld [vmem:[#allocation7] ss:$12 sps:$4 sm:$0xff]   ;;  %326 = vmatprep.subr.bf16.mxu1 %v755_v2  ;;  %v761_v6 = vld [vmem:[#allocation7 + $0x1c] ss:$12 sps:$4 sm:$0xff]   ;;  %v763_v7 = vld [vmem:[#allocation8 + $0x10] ss:$8 sps:$4 sm:$0xff]  }
  0x5e   :  { %206 = vmatpush1.bf16.msra.mxu0 %v757_v3  ;;  %327 = vmatpush1.bf16.msra.mxu1 %v758_v4  ;;  %v764_v8 = vld [vmem:[#allocation7 + $0x18] ss:$12 sps:$4 sm:$0xff]   ;;  %v767_v10 = vld [vmem:[#allocation7 + $0x34] ss:$12 sps:$4 sm:$0xff]   ;;  %v770_v12 = vld [vmem:[#allocation7 + $0x30] ss:$12 sps:$4 sm:$0xff]  }
  0x5f   :  { %207 = vmatprep.subr.bf16.mxu0 %v759_v5  ;;  %328 = vmatprep.subr.bf16.mxu1 %v761_v6  ;;  %v765_v9 = vld [vmem:[#allocation8 + $0x24] ss:$8 sps:$4 sm:$0xff]   ;;  %v769_v11 = vld [vmem:[#allocation8 + $0x20] ss:$8 sps:$4 sm:$0xff]   ;;  %v771_v13 = vld [vmem:[#allocation8 + $0x34] ss:$8 sps:$4 sm:$0xff]  }
  0x60   :  { %v773_v14 = vld [vmem:[#allocation7 + $0x4c] ss:$12 sps:$4 sm:$0xff]   ;;  %v776_v16 = vld [vmem:[#allocation7 + $0x48] ss:$12 sps:$4 sm:$0xff]   ;;  %v779_v18 = vld [vmem:[#allocation7 + $0x64] ss:$12 sps:$4 sm:$0xff]  }
  0x61   :  { %v775_v15 = vld [vmem:[#allocation8 + $0x30] ss:$8 sps:$4 sm:$0xff]   ;;  %v777_v17 = vld [vmem:[#allocation8 + $0x44] ss:$8 sps:$4 sm:$0xff]   ;;  %v781_v19 = vld [vmem:[#allocation8 + $0x40] ss:$8 sps:$4 sm:$0xff]  }
  0x62   :  { %208 = vmatpush1.bf16.msra.mxu0 %v763_v7  ;;  %329 = vmatpush1.bf16.msra.mxu1 %v764_v8  ;;  %v782_v20 = vld [vmem:[#allocation7 + $0x60] ss:$12 sps:$4 sm:$0xff]   ;;  %v783_v21 = vld [vmem:[#allocation8 + $0x54] ss:$8 sps:$4 sm:$0xff]   ;;  %v787_v23 = vld [vmem:[#allocation8 + $0x50] ss:$8 sps:$4 sm:$0xff]  }
  0x63   :  { %209 = vmatprep.subr.bf16.mxu0 %v765_v9  ;;  %330 = vmatprep.subr.bf16.mxu1 %v767_v10  ;;  %v785_v22 = vld [vmem:[#allocation7 + $0x7c] ss:$12 sps:$4 sm:$0xff]   ;;  %v788_v24 = vld [vmem:[#allocation7 + $0x78] ss:$12 sps:$4 sm:$0xff]   ;;  %v791_v26 = vld [vmem:[#allocation7 + $0x94] ss:$12 sps:$4 sm:$0xff]  }
  0x64   :  { %v789_v25 = vld [vmem:[#allocation8 + $0x64] ss:$8 sps:$4 sm:$0xff]   ;;  %v793_v27 = vld [vmem:[#allocation8 + $0x60] ss:$8 sps:$4 sm:$0xff]   ;;  %v794_v28 = vld [vmem:[#allocation7 + $0x90] ss:$12 sps:$4 sm:$0xff]  }
  0x65   :  { %v795_v29 = vld [vmem:[#allocation8 + $0x74] ss:$8 sps:$4 sm:$0xff]   ;;  %v797_v30 = vld [vmem:[#allocation7 + $0xac] ss:$12 sps:$4 sm:$0xff]   ;;  %v370_v38 = vshrl.u32 %v369_v37, 7  ;;  %v979_v43 = vmov 0.0  }
  0x66   :  { %210 = vmatpush1.bf16.msra.mxu0 %v769_v11  ;;  %331 = vmatpush1.bf16.msra.mxu1 %v770_v12  ;;  %v799_v31 = vld [vmem:[#allocation8 + $0x70] ss:$8 sps:$4 sm:$0xff]   ;;  %v800_v32 = vld [vmem:[#allocation7 + $0xa8] ss:$12 sps:$4 sm:$0xff]   ;;  %v802_v44 = vld [vmem:[#allocation10] sm:$0xff]   ;;  %vm980_vm0 = vmmov 0  }
  0x67   :  { %211 = vmatprep.subr.bf16.mxu0 %v771_v13  ;;  %332 = vmatprep.subr.bf16.mxu1 %v773_v14  ;;  %v90_v34 = vld [vmem:[#allocation5] sm:$0xff]  ;;  %v367_v39 = vld [vmem:[%s1122_s3] sm:$0x3]  ;;  %v375_v40 = vsub.s32 1, %v370_v38  ;;  %v801_v41 = vld [vmem:[#allocation7 + $0x8] ss:$12 sps:$4 sm:$0xff]  }
  0x68   :  { %v92_v36 = vpack.c.bf16 %v90_v34, %v90_v34  ;;  %v803_v45 = vld [vmem:[#allocation7 + $0x20] ss:$12 sps:$4 sm:$0xff]   ;;  %v805_v47 = vld [vmem:[#allocation7 + $0x38] ss:$12 sps:$4 sm:$0xff]   ;;  %v806_v48 = vld [vmem:[#allocation10 + $0x10] sm:$0xff]   ;;  %v371_v59 = vsub.s32 0, %v370_v38 }
  0x69   :  { %v1098_v42 = vrot.slane %v367_v39, %v375_v40  ;;  %v804_v46 = vld [vmem:[#allocation10 + $0x8] sm:$0xff]   ;;  %v807_v49 = vld [vmem:[#allocation7 + $0x50] ss:$12 sps:$4 sm:$0xff]   ;;  %v810_v52 = vld [vmem:[#allocation10 + $0x20] sm:$0xff]   ;;  %s981_s12 = smov [#allocation11]  }
  0x6a   :  { %212 = vmatpush1.bf16.msra.mxu0 %v775_v15  ;;  %333 = vmatpush1.bf16.msra.mxu1 %v776_v16  ;;  %v808_v50 = vld [vmem:[#allocation10 + $0x18] sm:$0xff]   ;;  %v809_v51 = vld [vmem:[#allocation7 + $0x68] ss:$12 sps:$4 sm:$0xff]   ;;  %v811_v53 = vld [vmem:[#allocation7 + $0x80] ss:$12 sps:$4 sm:$0xff]   ;;  %v372_v60 = vrot.slane %v367_v39, %v371_v59  ;;  %s620_s13 = sshll.u32 %s981_s12, 4  ;;  %s621_s13 = int_to_ptr.vmem [resolvable:$true] %s620_s13 }
  0x6b   :  { %213 = vmatprep.subr.bf16.mxu0 %v777_v17  ;;  %334 = vmatprep.subr.bf16.mxu1 %v779_v18  ;;  %v812_v54 = vld [vmem:[#allocation10 + $0x28] sm:$0xff]   ;;  %v813_v55 = vld [vmem:[#allocation7 + $0x98] ss:$12 sps:$4 sm:$0xff]   ;;  %v814_v56 = vld [vmem:[#allocation10 + $0x30] sm:$0xff]   ;;  %p942_p13 = scmp.lt.s32.totalorder %s621_s13, %s621_s13 }
  0x6c   :  { %v815_v57 = vld [vmem:[#allocation7 + $0xb0] ss:$12 sps:$4 sm:$0xff]  }
  0x6d   :  { %v816_v58 = vld [vmem:[#allocation10 + $0x38] sm:$0xff]  }
  0x6e   :  { %214 = vmatpush1.bf16.msra.mxu0 %v781_v19  ;;  %335 = vmatpush1.bf16.msra.mxu1 %v782_v20 }
  0x6f   :  { %215 = vmatprep.subr.bf16.mxu0 %v783_v21  ;;  %336 = vmatprep.subr.bf16.mxu1 %v785_v22 }
  0x72   :  { %216 = vmatpush1.bf16.msra.mxu0 %v787_v23  ;;  %337 = vmatpush1.bf16.msra.mxu1 %v788_v24  ;;  %v679_v24 = vld [vmem:[%s1122_s3 + $0x2] ss:$0 sm:$0xff]  ;;  %s937_s3 = scalar_lea.vmem %s621_s13, 128 }
  0x73   :  { %217 = vmatprep.subr.bf16.mxu0 %v789_v25  ;;  %338 = vmatprep.subr.bf16.mxu1 %v791_v26  ;;  %p938_p12 = scmp.ne.s32.totalorder %s621_s13, %s937_s3  ;;  %p943_p0 = scmp.lt.s32.totalorder %s937_s3, %s937_s3 }
  0x75   :  { %p944_p1 = por %p943_p0, %p942_p13 }
  0x76   :  { %218 = vmatpush1.bf16.msra.mxu0 %v793_v27  ;;  %339 = vmatpush1.bf16.msra.mxu1 %v794_v28 }
  0x77   :  { %219 = vmatprep.subr.bf16.mxu0 %v795_v29  ;;  %340 = vmatprep.subr.bf16.mxu1 %v797_v30  ;;  %p945_p2 = pnand %p944_p1, %p938_p12 }
  0x7a   :  { %220 = vmatpush1.bf16.msra.mxu0 %v799_v31  ;;  %341 = vmatpush1.bf16.msra.mxu1 %v800_v32 }
  0x7b   :  { %718 = vmatprep.subr.bf16.mxu1 %v979_v43  ;;  %698 = vmatprep.subr.bf16.mxu0 %v979_v43 }
  0x7d   :  { %238 = vmatmul.mubr.bf16.vlgmr.msra.gmra.mrb[0].mxu0 %v91_v35  ;;  %359 = vmatmul.mubr.bf16.vlgmr.msra.gmra.mrb[0].mxu1 %v92_v36 }
  0x7e   :  { %719 = vmatpush3.bf16.msra.mxu1 %v801_v41  ;;  %699 = vmatpush3.bf16.msra.mxu0 %v802_v44 }
  0x7f   :  { %720 = vmatprep.subr.bf16.mxu1 %v979_v43  ;;  %700 = vmatprep.subr.bf16.mxu0 %v979_v43 }
  0x80   :  { %734 = vmatprep.mubr.msk.bf16.mxu1 %vm980_vm0, %v979_v43  ;;  %714 = vmatprep.mubr.msk.bf16.mxu0 %vm980_vm0, %v979_v43 }
  0x82   :  { %721 = vmatpush3.bf16.msra.mxu1 %v803_v45  ;;  %701 = vmatpush3.bf16.msra.mxu0 %v804_v46 }
  0x83   :  { %722 = vmatprep.subr.bf16.mxu1 %v979_v43  ;;  %702 = vmatprep.subr.bf16.mxu0 %v979_v43 }
  0x86   :  { %723 = vmatpush3.bf16.msra.mxu1 %v805_v47  ;;  %703 = vmatpush3.bf16.msra.mxu0 %v806_v48 }
  0x87   :  { %724 = vmatprep.subr.bf16.mxu1 %v979_v43  ;;  %704 = vmatprep.subr.bf16.mxu0 %v979_v43 }
  0x8a   :  { %725 = vmatpush3.bf16.msra.mxu1 %v807_v49  ;;  %705 = vmatpush3.bf16.msra.mxu0 %v808_v50 }
  0x8b   :  { %726 = vmatprep.subr.bf16.mxu1 %v979_v43  ;;  %706 = vmatprep.subr.bf16.mxu0 %v979_v43 }
  0x8e   :  { %727 = vmatpush3.bf16.msra.mxu1 %v809_v51  ;;  %707 = vmatpush3.bf16.msra.mxu0 %v810_v52 }
  0x8f   :  { %728 = vmatprep.subr.bf16.mxu1 %v979_v43  ;;  %708 = vmatprep.subr.bf16.mxu0 %v979_v43 }
  0x92   :  { %729 = vmatpush3.bf16.msra.mxu1 %v811_v53  ;;  %709 = vmatpush3.bf16.msra.mxu0 %v812_v54 }
  0x93   :  { %730 = vmatprep.subr.bf16.mxu1 %v979_v43  ;;  %710 = vmatprep.subr.bf16.mxu0 %v979_v43 }
  0x96   :  { %731 = vmatpush3.bf16.msra.mxu1 %v813_v55  ;;  %711 = vmatpush3.bf16.msra.mxu0 %v814_v56 }
  0x97   :  { %732 = vmatprep.subr.bf16.mxu1 %v979_v43  ;;  %712 = vmatprep.subr.bf16.mxu0 %v979_v43 }
  0x9a   :  { %733 = vmatpush3.bf16.msra.mxu1 %v815_v57  ;;  %713 = vmatpush3.bf16.msra.mxu0 %v816_v58 }
  0x9d   :  { %735 = vmatmul.mubr.bf16.vlgmr.msra.gmra.mrb[4].mxu1 %v92_v36 }
 0x150   :  { %v239_v61 = vpop.f32.mrb[0].mxu0  ;;  %v360_v62 = vpop.f32.mrb[0].mxu1 }
 0x151   :  { %v361_v63 = vadd.f32 %v360_v62, %v239_v61  ;;  %v241_v0 = vpop.f32.mrb[1].mxu0  ;;  %v362_v1 = vpop.f32.mrb[1].mxu1 }
 0x152   :  { %v363_v2 = vadd.f32 %v362_v1, %v241_v0  ;;  %v243_v3 = vpop.f32.mrb[2].mxu0  ;;  %v364_v4 = vpop.f32.mrb[2].mxu1 }
 0x153   :  { %v379_v5 = vadd.f32 %v372_v60, %v361_v63  ;;  %v244_v6 = vpop.f32.mrb[3].mxu0  ;;  %v365_v7 = vpop.f32.mrb[3].mxu1 }
 0x154   :  { %v380_v8 = vadd.f32 %v1098_v42, %v363_v2 }
 0x155   :  { %v381_v9 = vsub.f32 0.0, %v379_v5 }
 0x156   :  { %v386_v20 = vsub.f32 0.0, %v380_v8 }
 0x157   :  { %v382_v10 = vmul.f32 1.442695, %v381_v9 }
 0x158   :  { %v387_v21 = vmul.f32 1.442695, %v386_v20 }
 0x159   :  { %817 = vpow2.f32 %v382_v10 }
 0x163   :  { %v818_v11 = vpop.eup %817 }
 0x164   :  { %v384_v12 = vadd.f32 1.0, %v818_v11 }
 0x166   :  { %819 = vrcp.f32 %v384_v12 }
 0x167   :  { %821 = vpow2.f32 %v387_v21 }
 0x170   :  { %v820_v13 = vpop.eup %819  ;;  %v595_v16 = vpop.f32.mrb[4].mxu1 }
 0x171   :  { %v407_v14 = vmul.f32 %v820_v13, %v1091_v33  ;;  %v736_v17 = vpop.f32.mrb[5].mxu1  ;;  %v822_v22 = vpop.eup %821 }
 0x172   :  { %v598_v18 = vpop.f32.mrb[6].mxu1  ;;  %v389_v28 = vadd.f32 1.0, %v822_v22 }
 0x173   :  { %v408_v15 = vpack.c.bf16 %v407_v14, %v407_v14  ;;  %v737_v19 = vpop.f32.mrb[7].mxu1 }
 0x175   :  { %715 = vmatmul.mubr.bf16.vlgmr.msra.gmra.mrb[4].mxu0 %v408_v15 }
 0x248   :  { %v507_v23 = vpop.f32.mrb[4].mxu0 }
 0x249   :  { %v596_v25 = vadd.f32 %v595_v16, %v507_v23  ;;  %v716_v26 = vpop.f32.mrb[5].mxu0 }
 0x24a   :  { %v510_v27 = vpop.f32.mrb[6].mxu0 }
 0x24b   :  { %v608_v29 = vadd.f32 %v679_v24, %v596_v25  ;;  %v717_v30 = vpop.f32.mrb[7].mxu0 }
 0x24d   :  { %823 = vtanh.f32 %v608_v29 }
 0x24e   :  { %825 = vrcp.f32 %v389_v28 }
 0x257   :  { %v824_v31 = vpop.eup %823 }
 0x258   :  { %v610_v32 = vsub.f32 %v824_v31, %v1091_v33  ;;  %v826_v34 = vpop.eup %825 }
 0x25a   :  { %v611_v35 = vmul.f32 %v826_v34, %v610_v32 }
 0x25c   :  { %v612_v36 = vadd.f32 %v611_v35, %v1091_v33 }
 0x25e   :  { %613 = vst [vmem:[#allocation11] sm:$0xff] %v612_v36 }
 0x25f   :  { %948 = shalt.err (!%p945_p2)
}
 0x260   :  { %s949_s16 = scalar_lea.hbm %s1125_s6, 128 }
 0x261   :  { %p950_p3 = scmp.ne.s32.totalorder %s1125_s6, %s949_s16  ;;  %p953_p4 = scmp.lt.u32.totalorder %s949_s16, %s1125_s6 }
 0x263   :  { %p955_p5 = pnand %p953_p4, %p950_p3 }
 0x265   :  { %958 = shalt.err (!%p955_p5)
}
 0x266   :  { %623 = dma.vmem_to_hbm [thread:$0]  %s621_s13, 128, %s1125_s6, [#allocation4]  }
 0x267   :  { %965 = dma.done.wait [#allocation4], 128  }
 0x268   :  { %966 = vsyncadd [#allocation4], 4294967168 }
 0x269   :  { %627 = vsyncpa [#allocation3], 1 }
 0x26a   :  { %628 = vsyncpa [#allocation6], 1 }
 0x26b   :  { %629 = vsyncpa [#allocation9], 1 }
 0x26c   :  { %630 = vsyncpa [#allocation4], 1 }

</bundles_post_ra>
